<compile_context>
chip_gen: v5e
topology: v5e:2x2
jax: 0.10.0
libtpu: 0.0.40
codegen_flags: <defaults>
</compile_context>

<pallas_src>
import functools

import jax
import jax.numpy as jnp
from jax.experimental import pallas as pl
from jax.experimental.pallas import tpu as pltpu


def _capsule_loss_kernel(classes_ref, labels_ref, images_ref, recon_ref,
                         out_ref, acc_ref, margin_ref,
                         *, tile_rows, batch, needs_mask):
    step = pl.program_id(0)

    # ---- init + margin term (tiny [B, K]; computed once, off the hot loop) ----
    @pl.when(step == 0)
    def _init():
        acc_ref[...] = jnp.zeros_like(acc_ref)
        c = classes_ref[...].astype(jnp.float32)
        l = labels_ref[...].astype(jnp.float32)
        left = jnp.maximum(0.9 - c, 0.0)
        right = jnp.maximum(c - 0.1, 0.0)
        left = left * left
        half_right = 0.5 * (right * right)
        # labels*left + 0.5*(1-labels)*right  ==  half_right + labels*(left - half_right)
        margin = half_right + l * (left - half_right)
        margin_ref[0] = jnp.sum(margin)

    # ---- hot loop: streaming squared diff, reduced per tile (no big scratch) ----
    diff = recon_ref[...].astype(jnp.float32) - images_ref[...].astype(jnp.float32)
    sq = diff * diff
    if needs_mask:
        # Last tile may extend past B; out-of-range rows contain garbage -> mask to 0.
        row = step * tile_rows + jax.lax.broadcasted_iota(jnp.int32, (tile_rows, 1), 0)
        sq = jnp.where(row < batch, sq, 0.0)
    # Per-tile full reduce: vreg combine on VPU (same add count as an element-wise
    # accumulator) + one cross-lane reduce on the XLU; avoids acc load/store traffic.
    acc_ref[...] += jnp.sum(sq)

    # ---- epilogue: combine margin + weighted reconstruction loss ----
    @pl.when(step == pl.num_programs(0) - 1)
    def _finalize():
        out_ref[0, 0] = (margin_ref[0] + 0.0005 * acc_ref[0, 0]) * (1.0 / batch)


def _pick_tile_rows(batch, d, itemsize):
    """Pick a batch-tile so each streaming input tile is ~4 MiB (sublane aligned)."""
    target_bytes = 4 << 20
    rows = target_bytes // max(1, d * itemsize)
    if rows >= batch:
        return batch                      # whole array is a single small tile
    rows = max(8, (rows // 8) * 8)        # keep (8, 128) block constraint satisfied
    return min(rows, batch)


def capsule_loss(images, labels, classes, reconstructions, *, tile_rows=None):
    """Pallas implementation of CapsuleLoss.forward.

    images:          [B, C, H, W] float (NCHW)
    labels:          [B, K] float (one-hot or soft targets)
    classes:         [B, K] float (capsule lengths / probabilities)
    reconstructions: [B, D] float, D == C*H*W
    returns: scalar float32 loss
    """
    B, D = reconstructions.shape
    assert images.size == reconstructions.size, "numel(images) != numel(reconstructions)"
    K = classes.shape[1]

    # Flatten row-major like torch .view(B, -1); keep native dtype (no HBM upcast).
    images_flat = images.reshape(B, D)

    itemsize = max(images_flat.dtype.itemsize, reconstructions.dtype.itemsize)
    TB = tile_rows if tile_rows is not None else _pick_tile_rows(B, D, itemsize)
    grid = (pl.cdiv(B, TB),)
    needs_mask = (B % TB) != 0

    kernel = functools.partial(
        _capsule_loss_kernel, tile_rows=TB, batch=B, needs_mask=needs_mask)

    flops = int(3 * B * D + 7 * B * K)
    bytes_accessed = int(
        images_flat.size * images_flat.dtype.itemsize
        + reconstructions.size * reconstructions.dtype.itemsize
        + classes.size * classes.dtype.itemsize
        + labels.size * labels.dtype.itemsize
        + 4)

    out = pl.pallas_call(
        kernel,
        out_shape=jax.ShapeDtypeStruct((1, 1), jnp.float32),
        grid=grid,
        in_specs=[
            pl.BlockSpec((B, K), lambda i: (0, 0)),    # classes (resident, fetched once)
            pl.BlockSpec((B, K), lambda i: (0, 0)),    # labels  (resident, fetched once)
            pl.BlockSpec((TB, D), lambda i: (i, 0)),   # images_flat (streamed)
            pl.BlockSpec((TB, D), lambda i: (i, 0)),   # reconstructions (streamed)
        ],
        out_specs=pl.BlockSpec(memory_space=pltpu.MemorySpace.SMEM),
        scratch_shapes=[
            pltpu.VMEM((1, 1), jnp.float32),           # recon-loss running sum
            pltpu.SMEM((1,), jnp.float32),             # margin_loss scalar
        ],
        compiler_params=pltpu.CompilerParams(
            dimension_semantics=("arbitrary",),        # reduction axis
            vmem_limit_bytes=40 << 20,
        ),
        cost_estimate=pl.CostEstimate(
            flops=flops, transcendentals=0, bytes_accessed=bytes_accessed),
    )(classes, labels, images_flat, reconstructions)
    return out[0, 0]


def _reference_loss(images, labels, classes, reconstructions):
    B = reconstructions.shape[0]
    left = jnp.maximum(0.9 - classes, 0.0) ** 2
    right = jnp.maximum(classes - 0.1, 0.0) ** 2
    margin = jnp.sum(labels * left + 0.5 * (1.0 - labels) * right)
    img = images.reshape(B, -1).astype(jnp.float32)
    recon_loss = jnp.sum((reconstructions.astype(jnp.float32) - img) ** 2)
    return (margin + 0.0005 * recon_loss) / B


if __name__ == "__main__":
    key = jax.random.PRNGKey(0)
    K = 10

    # --- case 1: tiny shapes (single grid step, TB == B) ---
    B, C, H, W = 2, 4, 16, 16
    D = C * H * W
    k1, k2, k3, k4, k5 = jax.random.split(key, 5)
    images = jax.random.uniform(k1, (B, C, H, W), dtype=jnp.float32)
    labels = jax.nn.one_hot(jax.random.randint(k2, (B,), 0, K), K, dtype=jnp.float32)
    classes = jax.random.uniform(k3, (B, K), dtype=jnp.float32)
    recon = jax.random.uniform(k4, (B, D), dtype=jnp.float32)

    loss = jax.block_until_ready(capsule_loss(images, labels, classes, recon))
    ref = _reference_loss(images, labels, classes, recon)
    assert jnp.allclose(loss, ref, rtol=1e-4, atol=1e-5), (loss, ref)

    # --- case 2: exercise the tiled/pipelined path with a ragged last tile ---
    B2 = 18
    k6, k7, k8, k9 = jax.random.split(k5, 4)
    images2 = jax.random.uniform(k6, (B2, C, H, W), dtype=jnp.float32)
    labels2 = jax.nn.one_hot(jax.random.randint(k7, (B2,), 0, K), K, dtype=jnp.float32)
    classes2 = jax.random.uniform(k8, (B2, K), dtype=jnp.float32)
    recon2 = jax.random.uniform(k9, (B2, D), dtype=jnp.float32)

    loss2 = jax.block_until_ready(
        capsule_loss(images2, labels2, classes2, recon2, tile_rows=8))
    ref2 = _reference_loss(images2, labels2, classes2, recon2)
    assert jnp.allclose(loss2, ref2, rtol=1e-4, atol=1e-5), (loss2, ref2)

    print("KERNEL_OK")
</pallas_src>

<mosaic_0001>
module attributes {stable_mosaic.version = 11 : i64} {
  func.func @_capsule_loss_kernel(%arg0: i32, %arg1: memref<2x10xf32, #tpu.memory_space<vmem>>, %arg2: memref<2x10xf32, #tpu.memory_space<vmem>>, %arg3: memref<2x1024xf32, #tpu.memory_space<vmem>>, %arg4: memref<2x1024xf32, #tpu.memory_space<vmem>>, %arg5: memref<1x1xf32, #tpu.memory_space<smem>>, %arg6: memref<1x1xf32, #tpu.memory_space<vmem>>, %arg7: memref<1xf32, #tpu.memory_space<smem>>) attributes {dimension_semantics = [#tpu.dimension_semantics<arbitrary>], iteration_bounds = array<i64: 1>, scalar_prefetch = 0 : i64, scratch_operands = 2 : i64, tpu.core_type = #tpu.core_type<tc>, window_params = [{pipeline_mode = #tpu.pipeline_mode<synchronous>, transform_indices = @transform_0, window_bounds = array<i64: 2, 10>}, {pipeline_mode = #tpu.pipeline_mode<synchronous>, transform_indices = @transform_1, window_bounds = array<i64: 2, 10>}, {transform_indices = @transform_2, window_bounds = array<i64: 2, 1024>}, {transform_indices = @transform_3, window_bounds = array<i64: 2, 1024>}, {transform_indices = @transform_4, window_bounds = array<i64: 1, 1>}]} {
    %c0_i32 = arith.constant 0 : i32
    %0 = arith.cmpi eq, %arg0, %c0_i32 : i32
    %1 = arith.extui %0 : i1 to i32
    %c0_i32_0 = arith.constant 0 : i32
    %2 = arith.cmpi ne, %1, %c0_i32_0 : i32
    scf.if %2 {
      %cst_10 = arith.constant 0.000000e+00 : f32
      %18 = vector.broadcast %cst_10 : f32 to vector<1x1xf32>
      %c0_11 = arith.constant 0 : index
      %c0_12 = arith.constant 0 : index
      %19 = vector.load %arg6[%c0_11, %c0_12] : memref<1x1xf32, #tpu.memory_space<vmem>>, vector<1x1xf32>
      tpu.vector_store %arg6[%c0_11, %c0_12], %18 {strides = array<i32>} : memref<1x1xf32, #tpu.memory_space<vmem>>, vector<1x1xf32>,
      %c0_13 = arith.constant 0 : index
      %c0_14 = arith.constant 0 : index
      %20 = vector.load %arg1[%c0_13, %c0_14] : memref<2x10xf32, #tpu.memory_space<vmem>>, vector<2x10xf32>
      %c0_15 = arith.constant 0 : index
      %c0_16 = arith.constant 0 : index
      %21 = vector.load %arg2[%c0_15, %c0_16] : memref<2x10xf32, #tpu.memory_space<vmem>>, vector<2x10xf32>
      %cst_17 = arith.constant 0.899999976 : f32
      %22 = vector.broadcast %cst_17 : f32 to vector<2x10xf32>
      %23 = arith.subf %22, %20 : vector<2x10xf32>
      %cst_18 = arith.constant 0.000000e+00 : f32
      %24 = vector.broadcast %cst_18 : f32 to vector<2x10xf32>
      %25 = arith.maximumf %23, %24 : vector<2x10xf32>
      %cst_19 = arith.constant 1.000000e-01 : f32
      %26 = vector.broadcast %cst_19 : f32 to vector<2x10xf32>
      %27 = arith.subf %20, %26 : vector<2x10xf32>
      %cst_20 = arith.constant 0.000000e+00 : f32
      %28 = vector.broadcast %cst_20 : f32 to vector<2x10xf32>
      %29 = arith.maximumf %27, %28 : vector<2x10xf32>
      %30 = arith.mulf %25, %25 : vector<2x10xf32>
      %31 = arith.mulf %29, %29 : vector<2x10xf32>
      %cst_21 = arith.constant 5.000000e-01 : f32
      %32 = vector.broadcast %cst_21 : f32 to vector<2x10xf32>
      %33 = arith.mulf %32, %31 : vector<2x10xf32>
      %34 = arith.subf %30, %33 : vector<2x10xf32>
      %35 = arith.mulf %21, %34 : vector<2x10xf32>
      %36 = arith.addf %33, %35 : vector<2x10xf32>
      %37 = vector.shape_cast %36 : vector<2x10xf32> to vector<1x2x10xf32>
      %cst_22 = arith.constant dense<0.000000e+00> : vector<1xf32>
      %38 = vector.multi_reduction <add>, %37, %cst_22 [1, 2] : vector<1x2x10xf32> to vector<1xf32>
      %39 = vector.shape_cast %38 : vector<1xf32> to vector<1x1x1xf32>
      %40 = vector.extract %39[0, 0, 0] : f32 from vector<1x1x1xf32>
      %c0_23 = arith.constant 0 : index
      %41 = memref.load %arg7[%c0_23] : memref<1xf32, #tpu.memory_space<smem>>
      memref.store %40, %arg7[%c0_23] : memref<1xf32, #tpu.memory_space<smem>>
    } else {
    }
    %c0 = arith.constant 0 : index
    %c0_1 = arith.constant 0 : index
    %3 = vector.load %arg4[%c0, %c0_1] : memref<2x1024xf32, #tpu.memory_space<vmem>>, vector<2x1024xf32>
    %c0_2 = arith.constant 0 : index
    %c0_3 = arith.constant 0 : index
    %4 = vector.load %arg3[%c0_2, %c0_3] : memref<2x1024xf32, #tpu.memory_space<vmem>>, vector<2x1024xf32>
    %5 = arith.subf %3, %4 : vector<2x1024xf32>
    %6 = arith.mulf %5, %5 : vector<2x1024xf32>
    %c0_4 = arith.constant 0 : index
    %c0_5 = arith.constant 0 : index
    %7 = vector.load %arg6[%c0_4, %c0_5] : memref<1x1xf32, #tpu.memory_space<vmem>>, vector<1x1xf32>
    %8 = vector.shape_cast %6 : vector<2x1024xf32> to vector<1x2x1024xf32>
    %cst = arith.constant dense<0.000000e+00> : vector<1xf32>
    %9 = vector.multi_reduction <add>, %8, %cst [1, 2] : vector<1x2x1024xf32> to vector<1xf32>
    %10 = vector.shape_cast %9 : vector<1xf32> to vector<1x1x1xf32>
    %11 = vector.extract %10[0, 0, 0] : f32 from vector<1x1x1xf32>
    %12 = vector.broadcast %11 : f32 to vector<1x1xf32>
    %13 = arith.addf %7, %12 : vector<1x1xf32>
    %c0_6 = arith.constant 0 : index
    %c0_7 = arith.constant 0 : index
    %14 = vector.load %arg6[%c0_6, %c0_7] : memref<1x1xf32, #tpu.memory_space<vmem>>, vector<1x1xf32>
    tpu.vector_store %arg6[%c0_6, %c0_7], %13 {strides = array<i32>} : memref<1x1xf32, #tpu.memory_space<vmem>>, vector<1x1xf32>,
    %c0_i32_8 = arith.constant 0 : i32
    %15 = arith.cmpi eq, %arg0, %c0_i32_8 : i32
    %16 = arith.extui %15 : i1 to i32
    %c0_i32_9 = arith.constant 0 : i32
    %17 = arith.cmpi ne, %16, %c0_i32_9 : i32
    scf.if %17 {
      %c0_10 = arith.constant 0 : index
      %18 = memref.load %arg7[%c0_10] : memref<1xf32, #tpu.memory_space<smem>>
      %c0_11 = arith.constant 0 : index
      %c0_12 = arith.constant 0 : index
      %19 = vector.load %arg6[%c0_11, %c0_12] : memref<1x1xf32, #tpu.memory_space<vmem>>, vector<1x1xf32>
      %20 = vector.extract %19[0, 0] : f32 from vector<1x1xf32>
      %cst_13 = arith.constant 5.000000e-04 : f32
      %21 = arith.mulf %cst_13, %20 : f32
      %22 = arith.addf %18, %21 : f32
      %cst_14 = arith.constant 5.000000e-01 : f32
      %23 = arith.mulf %22, %cst_14 : f32
      %c0_15 = arith.constant 0 : index
      %c0_16 = arith.constant 0 : index
      %24 = memref.load %arg5[%c0_15, %c0_16] : memref<1x1xf32, #tpu.memory_space<smem>>
      memref.store %23, %arg5[%c0_15, %c0_16] : memref<1x1xf32, #tpu.memory_space<smem>>
    } else {
    }
    return
  }
  func.func @transform_0(%arg0: i32) -> (i32, i32) {
    %c0_i32 = arith.constant 0 : i32
    %c0_i32_0 = arith.constant 0 : i32
    %c0_i32_1 = arith.constant 0 : i32
    return %c0_i32, %c0_i32_0 : i32, i32
  }
  func.func @transform_1(%arg0: i32) -> (i32, i32) {
    %c0_i32 = arith.constant 0 : i32
    %c0_i32_0 = arith.constant 0 : i32
    %c0_i32_1 = arith.constant 0 : i32
    return %c0_i32, %c0_i32_0 : i32, i32
  }
  func.func @transform_2(%arg0: i32) -> (i32, i32) {
    %c0_i32 = arith.constant 0 : i32
    %c0_i32_0 = arith.constant 0 : i32
    return %arg0, %c0_i32 : i32, i32
  }
  func.func @transform_3(%arg0: i32) -> (i32, i32) {
    %c0_i32 = arith.constant 0 : i32
    %c0_i32_0 = arith.constant 0 : i32
    return %arg0, %c0_i32 : i32, i32
  }
  func.func @transform_4(%arg0: i32) -> (i32, i32) {
    %c0_i32 = arith.constant 0 : i32
    %c0_i32_0 = arith.constant 0 : i32
    %c0_i32_1 = arith.constant 0 : i32
    return %c0_i32, %c0_i32_0 : i32, i32
  }
}

</mosaic_0001>

<bundles_post_ra>
// kernel: tpu_custom_call.1
= control target key start
LH: loop header
LB: loop body
LE: loop exit
PB: predicated region body
PF: predicated region fallthrough
CT: control target
= control target key end

     0   :  { %9 = vsyncpa [#allocation5], 0  ;;  %s375_s0 = inlined_call_operand.hbm [shape: f32[2,10], index: 0, kind: input, shape index: {}]   ;;  %s376_s1 = inlined_call_operand.hbm [shape: f32[2,10], index: 1, kind: input, shape index: {}]   ;;  %s377_s2 = inlined_call_operand.hbm [shape: f32[2,1024], index: 2, kind: input, shape index: {}]   ;;  %s378_s3 = inlined_call_operand.hbm [shape: f32[2,1024], index: 3, kind: input, shape index: {}]   ;;  %s379_s4 = inlined_call_operand.hbm [shape: f32[1,1], index: 4, kind: output, shape index: {}]  }
   0x1   :  { %10 = vsyncpa [#allocation8], 0 }
   0x2   :  { %11 = vsyncpa [#allocation11], 0  ;;  %s29_s17 = sshll.u32 %s376_s1, 4  ;;  %s30_s17 = int_to_ptr.hbm [resolvable:$true] %s29_s17 }
   0x3   :  { %12 = vsyncpa [#allocation6], 0  ;;  %s321_s18 = smov [#allocation7]   ;;  %s18_s22 = sshll.u32 %s375_s0, 4  ;;  %s19_s22 = int_to_ptr.hbm [resolvable:$true] %s18_s22 }
   0x4   :  { %s31_s19 = sshll.u32 %s321_s18, 4  ;;  %s322_s23 = smov [#allocation4]   ;;  %s32_s19 = int_to_ptr.vmem [resolvable:$true] %s31_s19 }
   0x5   :  { %34 = dma.hbm_to_vmem [thread:$0]  %s30_s17, 32, %s32_s19, [#allocation8]  }
   0x6   :  { %s20_s24 = sshll.u32 %s322_s23, 4  ;;  %s40_s27 = sshll.u32 %s377_s2, 4  ;;  %s21_s24 = int_to_ptr.vmem [resolvable:$true] %s20_s24  ;;  %s41_s27 = int_to_ptr.hbm [resolvable:$true] %s40_s27 }
   0x7   :  { %23 = dma.hbm_to_vmem [thread:$0]  %s19_s22, 32, %s21_s24, [#allocation5]  }
   0x8   :  { %s51_s29 = sshll.u32 %s378_s3, 4  ;;  %s323_s30 = smov [#allocation9]   ;;  %s52_s29 = int_to_ptr.hbm [resolvable:$true] %s51_s29 }
   0x9   :  { %s42_s5 = sshll.u32 %s323_s30, 4  ;;  %s324_s0 = smov [#allocation10]   ;;  %s43_s5 = int_to_ptr.vmem [resolvable:$true] %s42_s5 }
   0xa   :  { %45 = dma.hbm_to_vmem [thread:$0]  %s41_s27, 256, %s43_s5, [#allocation8]  }
   0xb   :  { %s53_s6 = sshll.u32 %s324_s0, 4  ;;  %s54_s6 = int_to_ptr.vmem [resolvable:$true] %s53_s6 }
   0xc   :  { %56 = dma.hbm_to_vmem [thread:$0]  %s52_s29, 256, %s54_s6, [#allocation11]  }
   0xd   :  { %313 = dma.done.wait [#allocation5], 32  }
   0xe   :  { %314 = vsyncadd [#allocation5], 4294967264 }
   0xf   :  { %315 = dma.done.wait [#allocation8], 288  }
  0x10   :  { %316 = vsyncadd [#allocation8], 4294967008 }
  0x11   :  { %317 = dma.done.wait [#allocation11], 256  }
  0x12   :  { %318 = vsyncadd [#allocation11], 4294967040  ;;  %v79_v0 = vld [vmem:[#allocation4] sm:$0x3]  ;;  %v104_v1 = vld [vmem:[#allocation10] sm:$0xff]  ;;  %vm91_vm0 = vcmask 74752  }
  0x13   :  { %v81_v2 = vsub.f32 0.9, %v79_v0  ;;  %v192_v3 = vadd.f32 -0.1, %v79_v0  ;;  %v105_v4 = vld [vmem:[#allocation10 + $0x8] sm:$0xff]  ;;  %v106_v5 = vld [vmem:[#allocation9] sm:$0xff] }
  0x14   :  { %v107_v6 = vld [vmem:[#allocation9 + $0x8] sm:$0xff]  ;;  %v108_v7 = vsub.f32 %v104_v1, %v106_v5  ;;  %v80_v16 = vld [vmem:[#allocation7] sm:$0x3]  ;;  %vm134_vm1 = vcmask 1041408   ;;  %vm77_vm2 = vcmask 0   ;;  %v325_v58 = vmov 0.0  }
  0x15   :  { %v82_v8 = vmax.f32 %v81_v2, 0.0  ;;  %v84_v9 = vmax.f32 %v192_v3, 0.0  ;;  %v109_v10 = vsub.f32 %v105_v4, %v107_v6  ;;  %78 = vst.msk [vmem:[#allocation2] sm:$0x1] %vm77_vm2, %v325_v58  ;;  %s179_s11 = sshll.u32 %s379_s4, 4  ;;  %s326_s14 = smov [#allocation12]   ;;  %s180_s11 = int_to_ptr.hbm [resolvable:$true] %s179_s11 }
  0x16   :  { %v110_v11 = vmul.f32 %v108_v7, %v108_v7 }
  0x17   :  { %v85_v12 = vmul.f32 %v82_v8, %v82_v8  ;;  %v86_v13 = vmul.f32 %v84_v9, %v84_v9  ;;  %v111_v14 = vmul.f32 %v109_v10, %v109_v10 }
  0x18   :  { %115 = vst [vmem:[#allocation1] ss:$4 sm:$0xff] %v110_v11 }
  0x19   :  { %v87_v15 = vmul.f32 0.5, %v86_v13  ;;  %117 = vst [vmem:[#allocation1 + $0x20] ss:$4 sm:$0xff] %v111_v14 }
  0x1b   :  { %v88_v17 = vsub.f32 %v85_v12, %v87_v15 }
  0x1c   :  { %v112_v59 = vld [vmem:[#allocation2] sm:$0x1] }
  0x1d   :  { %v89_v18 = vmul.f32 %v88_v17, %v80_v16 }
  0x1f   :  { %v90_v19 = vadd.f32 %v89_v18, %v87_v15  ;;  %v118_v20 = vld.sshfl [vmem:[#allocation1] sm:$0xff pattern:$0x73625140]  ;;  %v119_v21 = vld.sshfl [vmem:[#allocation1 + $0x8] sm:$0xff pattern:$0x73625140] }
  0x20   :  { %v120_v22 = vld.sshfl [vmem:[#allocation1 + $0x10] sm:$0xff pattern:$0x73625140]  ;;  %v121_v23 = vld.sshfl [vmem:[#allocation1 + $0x18] sm:$0xff pattern:$0x73625140] }
  0x21   :  { %v92_v24 = vsel %vm91_vm0, %v90_v19, 0.0  ;;  %v135_v25 = vsel %vm134_vm1, %v118_v20, 0.0  ;;  %v136_v26 = vsel %vm134_vm1, %v119_v21, 0.0  ;;  %v122_v27 = vld.sshfl [vmem:[#allocation1 + $0x20] sm:$0xff pattern:$0x73625140] }
  0x22   :  { %93 = vadd.xlane.f32.xlu0 %v92_v24  ;;  %v137_v28 = vadd.f32 %v136_v26, %v135_v25  ;;  %v138_v29 = vsel %vm134_vm1, %v120_v22, 0.0  ;;  %v140_v30 = vsel %vm134_vm1, %v121_v23, 0.0  ;;  %v123_v31 = vld.sshfl [vmem:[#allocation1 + $0x28] sm:$0xff pattern:$0x73625140]  ;;  %v142_v33 = vsel %vm134_vm1, %v122_v27, 0.0 }
  0x23   :  { %v124_v34 = vld.sshfl [vmem:[#allocation1 + $0x30] sm:$0xff pattern:$0x73625140]  ;;  %v144_v36 = vsel %vm134_vm1, %v123_v31, 0.0 }
  0x24   :  { %v139_v32 = vadd.f32 %v138_v29, %v137_v28  ;;  %v125_v37 = vld.sshfl [vmem:[#allocation1 + $0x38] sm:$0xff pattern:$0x73625140]  ;;  %v146_v39 = vsel %vm134_vm1, %v124_v34, 0.0 }
  0x25   :  { %v148_v41 = vsel %vm134_vm1, %v125_v37, 0.0 }
  0x26   :  { %v141_v35 = vadd.f32 %v140_v30, %v139_v32 }
  0x28   :  { %v143_v38 = vadd.f32 %v142_v33, %v141_v35 }
  0x2a   :  { %v145_v40 = vadd.f32 %v144_v36, %v143_v38 }
  0x2c   :  { %v147_v42 = vadd.f32 %v146_v39, %v145_v40 }
  0x2e   :  { %v149_v43 = vadd.f32 %v148_v41, %v147_v42 }
  0x30   :  { %150 = vadd.xlane.f32.xlu0 %v149_v43 }
  0x95   :  { %v94_v44 = vpop.xlane.xlu0 %93 }
  0x96   :  { %v95_v45 = vrot.slane %v94_v44, 4 }
  0x98   :  { %v96_v46 = vadd.f32 %v95_v45, %v94_v44 }
  0x9a   :  { %v97_v47 = vrot.slane %v96_v46, 2 }
  0x9c   :  { %v98_v48 = vadd.f32 %v97_v47, %v96_v46 }
  0x9e   :  { %v99_v49 = vrot.slane %v98_v48, 1 }
  0xa0   :  { %v100_v50 = vadd.f32 %v99_v49, %v98_v48 }
  0xa2   :  { %193 = vpush %v100_v50 }
  0xa3   :  { %v151_v51 = vpop.xlane.xlu0 %150 }
  0xa4   :  { %v152_v52 = vrot.slane %v151_v51, 4 }
  0xa6   :  { %v153_v53 = vadd.f32 %v152_v52, %v151_v51 }
  0xa8   :  { %v154_v54 = vrot.slane %v153_v53, 2 }
  0xaa   :  { %v155_v55 = vadd.f32 %v154_v54, %v153_v53 }
  0xac   :  { %v156_v56 = vrot.slane %v155_v55, 1 }
  0xae   :  { %v157_v57 = vadd.f32 %v156_v56, %v155_v55 }
  0xb0   :  { %195 = vpush %v157_v57 }
  0xd3   :  { %s194_s2 = spop %193 }
  0xe1   :  { %s196_s3 = spop %195 }
  0xe2   :  { %v159_v60 = vstv %s196_s3 }
  0xe3   :  { %v160_v61 = vadd.f32 %v159_v60, %v112_v59 }
  0xe5   :  { %162 = vst.msk [vmem:[#allocation2] sm:$0x1] %vm77_vm2, %v160_v61 }
  0xec   :  { %v167_v62 = vld [vmem:[#allocation2] sm:$0x1] }
  0xed   :  { %197 = vpush %v167_v62 }
 0x11e   :  { %s198_s7 = spop %197 }
 0x11f   :  { %s169_s8 = smul.f32 0.0005, %s198_s7 }
 0x121   :  { %s170_s12 = sadd.f32 %s194_s2, %s169_s8 }
 0x123   :  { %s171_s13 = smul.f32 0.5, %s170_s12 }
 0x125   :  { %173 = sst [smem:[#allocation12]] %s171_s13 }
 0x126   :  { %182 = dma.smem_to_hbm %s326_s14, 16, %s180_s11, [#allocation6]  }
 0x127   :  { %319 = dma.done.wait [#allocation6], 16  }
 0x128   :  { %320 = vsyncadd [#allocation6], 4294967280 }
 0x129   :  { %187 = sfence }
 0x12a   :  { %188 = vsyncpa [#allocation5], 1 }
 0x12b   :  { %189 = vsyncpa [#allocation8], 1 }
 0x12c   :  { %190 = vsyncpa [#allocation11], 1 }
 0x12d   :  { %191 = vsyncpa [#allocation6], 1 }

</bundles_post_ra>
